<compile_context>
chip_gen: v5e
topology: v5e:2x2
jax: 0.10.0
libtpu: 0.0.40
codegen_flags: <defaults>
</compile_context>

<pallas_src>
import numpy as np
import jax
import jax.numpy as jnp
from jax.experimental import pallas as pl
from jax.experimental.pallas import tpu as pltpu


def _up_kernel(x_ref, w_ref, b_ref, d_ref, f_ref, o_ref):
    # x_ref: (1, Cin, S)        source pixels of th image rows, S = th*W
    # w_ref: (Cout, Cin)        1x1 conv weight
    # b_ref: (Cout, 1)          bias (broadcasts over the lane/spatial axis)
    # d_ref: (S, 4*S)           constant 0/1 nearest-x2 duplication matrix
    # f_ref: (1, Cf, 4*S)       skip feature-map pixels of the same output rows
    # o_ref: (1, Cout+Cf, 4*S)  output block (channels on sublane, spatial lane-dense)
    cout = w_ref.shape[0]
    # 1x1 conv on the *small* (pre-upsample) tile; spatial sits on the MXU N axis.
    conv = jnp.dot(w_ref[...], x_ref[0], preferred_element_type=jnp.float32)
    conv = conv + b_ref[...]
    # Fused nearest-x2 upsample: every source column feeds its 4 output columns.
    up = jnp.dot(conv, d_ref[...], preferred_element_type=jnp.float32)
    # Channel concat as two direct slice stores (no concatenate / lane splice).
    o_ref[0, :cout, :] = up.astype(o_ref.dtype)
    o_ref[0, cout:, :] = f_ref[0]


def _pick_rows_per_block(H, W, max_lane):
    """Largest th | H with S = th*W <= max_lane and S lane-aligned (or th == H)."""
    best = None
    for th in range(1, H + 1):
        if H % th:
            continue
        s = th * W
        if s > max_lane:
            break
        if s % 128 == 0 or th == H:
            best = th
    return best if best is not None else H


def _upsample_matrix(S, W, dtype):
    """D[s, j] = 1 iff source flat index s (= r*W + w) of a (th, W) tile feeds
    output flat index j (= (2r+dy)*2W + 2w+dx) under nearest x2 upsampling."""
    j = np.arange(4 * S)
    y, xw = j // (2 * W), j % (2 * W)
    src = (y // 2) * W + (xw // 2)                       # (4S,)
    d = (np.arange(S)[:, None] == src[None, :]).astype(np.float32)
    return jnp.asarray(d, dtype=dtype)


def up_forward(x, feature_map, weight, bias, *, max_lane=512):
    """Pallas forward of Up:  cat(Conv1x1(nearest_up2(x)), feature_map, dim=1).

    x:           (N, Cin, H, W)   NCHW
    feature_map: (N, Cf, 2H, 2W)
    weight:      (Cout, Cin, 1, 1)
    bias:        (Cout,)
    returns:     (N, Cout+Cf, 2H, 2W)
    """
    N, Cin, H, W = x.shape
    Cout = weight.shape[0]
    Cf = feature_map.shape[1]
    Ctot = Cout + Cf

    th = _pick_rows_per_block(H, W, max_lane)
    S = th * W
    nblk = H // th

    # Free reshapes: flatten spatial so the kernel sees (channels, spatial) tiles.
    x3 = x.reshape(N, Cin, H * W)
    f3 = feature_map.reshape(N, Cf, 4 * H * W)
    w2 = weight.reshape(Cout, Cin)
    b2 = bias.reshape(Cout, 1)
    dmat = _upsample_matrix(S, W, x.dtype)

    itemsize = jnp.dtype(x.dtype).itemsize
    flops = 2 * N * H * W * Cin * Cout + 8 * N * H * W * S * Cout
    bytes_accessed = (x3.size + f3.size + w2.size + b2.size + dmat.size
                      + N * Ctot * 4 * H * W) * itemsize

    out3 = pl.pallas_call(
        _up_kernel,
        out_shape=jax.ShapeDtypeStruct((N, Ctot, 4 * H * W), x.dtype),
        grid=(N, nblk),
        in_specs=[
            pl.BlockSpec((1, Cin, S), lambda n, i: (n, 0, i)),
            pl.BlockSpec((Cout, Cin), lambda n, i: (0, 0)),
            pl.BlockSpec((Cout, 1), lambda n, i: (0, 0)),
            pl.BlockSpec((S, 4 * S), lambda n, i: (0, 0)),
            pl.BlockSpec((1, Cf, 4 * S), lambda n, i: (n, 0, i)),
        ],
        out_specs=pl.BlockSpec((1, Ctot, 4 * S), lambda n, i: (n, 0, i)),
        compiler_params=pltpu.CompilerParams(
            dimension_semantics=("parallel", "parallel"),
            vmem_limit_bytes=32 * 1024 * 1024,
        ),
        cost_estimate=pl.CostEstimate(
            flops=flops, transcendentals=0, bytes_accessed=int(bytes_accessed)),
    )(x3, w2, b2, dmat, f3)

    return out3.reshape(N, Ctot, 2 * H, 2 * W)


def ref_forward(x, feature_map, weight, bias):
    """Pure-JAX reference matching the PyTorch semantics (NCHW)."""
    up = jnp.repeat(jnp.repeat(x, 2, axis=2), 2, axis=3)
    w2 = weight.reshape(weight.shape[0], weight.shape[1])
    conv = jnp.einsum('nchw,oc->nohw', up, w2) + bias[None, :, None, None]
    return jnp.concatenate([conv, feature_map], axis=1)


def _run_case(key, N, Cin, H, W, Cf, max_lane):
    k_x, k_f, k_w, k_b = jax.random.split(key, 4)
    Cout = Cin // 2
    x = jax.random.normal(k_x, (N, Cin, H, W), dtype=jnp.float32)
    fmap = jax.random.normal(k_f, (N, Cf, 2 * H, 2 * W), dtype=jnp.float32)
    weight = jax.random.normal(k_w, (Cout, Cin, 1, 1), dtype=jnp.float32) * 0.1
    bias = jax.random.normal(k_b, (Cout,), dtype=jnp.float32) * 0.1

    fwd = jax.jit(up_forward, static_argnames=("max_lane",))
    out = jax.block_until_ready(fwd(x, fmap, weight, bias, max_lane=max_lane))
    ref = ref_forward(x, fmap, weight, bias)

    assert out.shape == (N, Cout + Cf, 2 * H, 2 * W), out.shape
    assert jnp.allclose(out, ref, atol=1e-4, rtol=1e-4), "mismatch vs reference"


if __name__ == "__main__":
    key = jax.random.PRNGKey(0)
    k1, k2 = jax.random.split(key)

    # Up(channel=4): x (2,4,16,16), skip feature map (2,2,32,32)
    _run_case(k1, N=2, Cin=4, H=16, W=16, Cf=2, max_lane=512)
    # Second config: Up(channel=8), rectangular spatial, exercises multi-block
    # spatial tiling (row-block index > 0 in every index_map).
    _run_case(k2, N=1, Cin=8, H=16, W=32, Cf=4, max_lane=128)

    print("KERNEL_OK")
</pallas_src>

<mosaic_0001>
module attributes {stable_mosaic.version = 11 : i64} {
  func.func @_up_kernel(%arg0: i32, %arg1: i32, %arg2: memref<1x4x256xf32, #tpu.memory_space<vmem>>, %arg3: memref<2x4xf32, #tpu.memory_space<vmem>>, %arg4: memref<2x1xf32, #tpu.memory_space<vmem>>, %arg5: memref<256x1024xf32, #tpu.memory_space<vmem>>, %arg6: memref<1x2x1024xf32, #tpu.memory_space<vmem>>, %arg7: memref<1x4x1024xf32, #tpu.memory_space<vmem>>) attributes {dimension_semantics = [#tpu.dimension_semantics<parallel>, #tpu.dimension_semantics<parallel>], iteration_bounds = array<i64: 2, 1>, scalar_prefetch = 0 : i64, scratch_operands = 0 : i64, tpu.core_type = #tpu.core_type<tc>, window_params = [{transform_indices = @transform_0, window_bounds = array<i64: 1, 4, 256>}, {pipeline_mode = #tpu.pipeline_mode<synchronous>, transform_indices = @transform_1, window_bounds = array<i64: 2, 4>}, {pipeline_mode = #tpu.pipeline_mode<synchronous>, transform_indices = @transform_2, window_bounds = array<i64: 2, 1>}, {pipeline_mode = #tpu.pipeline_mode<synchronous>, transform_indices = @transform_3, window_bounds = array<i64: 256, 1024>}, {transform_indices = @transform_4, window_bounds = array<i64: 1, 2, 1024>}, {transform_indices = @transform_5, window_bounds = array<i64: 1, 4, 1024>}]} {
    %c0 = arith.constant 0 : index
    %c0_0 = arith.constant 0 : index
    %0 = vector.load %arg3[%c0, %c0_0] : memref<2x4xf32, #tpu.memory_space<vmem>>, vector<2x4xf32>
    %c0_1 = arith.constant 0 : index
    %c0_2 = arith.constant 0 : index
    %c0_3 = arith.constant 0 : index
    %1 = vector.load %arg2[%c0_1, %c0_2, %c0_3] : memref<1x4x256xf32, #tpu.memory_space<vmem>>, vector<1x4x256xf32>
    %2 = vector.shape_cast %1 : vector<1x4x256xf32> to vector<4x256xf32>
    %cst = arith.constant dense<0.000000e+00> : vector<2x256xf32>
    %3 = tpu.matmul %0, %2, %cst {dimension_numbers = #tpu.dot_dimension_numbers<[1], [0], [0], [1], [0, 0, 1, 1], [], []>} : vector<2x4xf32>, vector<4x256xf32>, vector<2x256xf32> -> vector<2x256xf32>
    %c0_4 = arith.constant 0 : index
    %c0_5 = arith.constant 0 : index
    %4 = vector.load %arg4[%c0_4, %c0_5] : memref<2x1xf32, #tpu.memory_space<vmem>>, vector<2x1xf32>
    %5 = vector.broadcast %4 : vector<2x1xf32> to vector<2x256xf32>
    %6 = arith.addf %3, %5 : vector<2x256xf32>
    %c0_6 = arith.constant 0 : index
    %c0_7 = arith.constant 0 : index
    %7 = vector.load %arg5[%c0_6, %c0_7] : memref<256x1024xf32, #tpu.memory_space<vmem>>, vector<256x1024xf32>
    %cst_8 = arith.constant dense<0.000000e+00> : vector<2x1024xf32>
    %8 = tpu.matmul %6, %7, %cst_8 {dimension_numbers = #tpu.dot_dimension_numbers<[1], [0], [0], [1], [0, 0, 1, 1], [], []>} : vector<2x256xf32>, vector<256x1024xf32>, vector<2x1024xf32> -> vector<2x1024xf32>
    %c0_9 = arith.constant 0 : index
    %c0_10 = arith.constant 0 : index
    %c0_11 = arith.constant 0 : index
    %9 = vector.load %arg7[%c0_9, %c0_10, %c0_11] : memref<1x4x1024xf32, #tpu.memory_space<vmem>>, vector<1x2x1024xf32>
    %10 = vector.shape_cast %9 : vector<1x2x1024xf32> to vector<2x1024xf32>
    %11 = vector.shape_cast %8 : vector<2x1024xf32> to vector<1x2x1024xf32>
    tpu.vector_store %arg7[%c0_9, %c0_10, %c0_11], %11 {strides = array<i32>} : memref<1x4x1024xf32, #tpu.memory_space<vmem>>, vector<1x2x1024xf32>,
    %c0_12 = arith.constant 0 : index
    %c0_13 = arith.constant 0 : index
    %c0_14 = arith.constant 0 : index
    %12 = vector.load %arg6[%c0_12, %c0_13, %c0_14] : memref<1x2x1024xf32, #tpu.memory_space<vmem>>, vector<1x2x1024xf32>
    %13 = vector.shape_cast %12 : vector<1x2x1024xf32> to vector<2x1024xf32>
    %c0_15 = arith.constant 0 : index
    %c2 = arith.constant 2 : index
    %c0_16 = arith.constant 0 : index
    %14 = vector.load %arg7[%c0_15, %c2, %c0_16] : memref<1x4x1024xf32, #tpu.memory_space<vmem>>, vector<1x2x1024xf32>
    %15 = vector.shape_cast %14 : vector<1x2x1024xf32> to vector<2x1024xf32>
    %16 = vector.shape_cast %13 : vector<2x1024xf32> to vector<1x2x1024xf32>
    tpu.vector_store %arg7[%c0_15, %c2, %c0_16], %16 {strides = array<i32>} : memref<1x4x1024xf32, #tpu.memory_space<vmem>>, vector<1x2x1024xf32>,
    return
  }
  func.func @transform_0(%arg0: i32, %arg1: i32) -> (i32, i32, i32) {
    %c0_i32 = arith.constant 0 : i32
    %c0_i32_0 = arith.constant 0 : i32
    return %arg0, %c0_i32, %arg1 : i32, i32, i32
  }
  func.func @transform_1(%arg0: i32, %arg1: i32) -> (i32, i32) {
    %c0_i32 = arith.constant 0 : i32
    %c0_i32_0 = arith.constant 0 : i32
    %c0_i32_1 = arith.constant 0 : i32
    return %c0_i32, %c0_i32_0 : i32, i32
  }
  func.func @transform_2(%arg0: i32, %arg1: i32) -> (i32, i32) {
    %c0_i32 = arith.constant 0 : i32
    %c0_i32_0 = arith.constant 0 : i32
    %c0_i32_1 = arith.constant 0 : i32
    return %c0_i32, %c0_i32_0 : i32, i32
  }
  func.func @transform_3(%arg0: i32, %arg1: i32) -> (i32, i32) {
    %c0_i32 = arith.constant 0 : i32
    %c0_i32_0 = arith.constant 0 : i32
    %c0_i32_1 = arith.constant 0 : i32
    return %c0_i32, %c0_i32_0 : i32, i32
  }
  func.func @transform_4(%arg0: i32, %arg1: i32) -> (i32, i32, i32) {
    %c0_i32 = arith.constant 0 : i32
    %c0_i32_0 = arith.constant 0 : i32
    return %arg0, %c0_i32, %arg1 : i32, i32, i32
  }
  func.func @transform_5(%arg0: i32, %arg1: i32) -> (i32, i32, i32) {
    %c0_i32 = arith.constant 0 : i32
    %c0_i32_0 = arith.constant 0 : i32
    return %arg0, %c0_i32, %arg1 : i32, i32, i32
  }
}

</mosaic_0001>

<bundles_post_ra>
// kernel: up_forward.1
= control target key start
LH: loop header
LB: loop body
LE: loop exit
PB: predicated region body
PF: predicated region fallthrough
CT: control target
= control target key end

     0   :  { %10 = vsyncpa [#allocation3], 0  ;;  %s1268_s18 = smov 0   ;;  %s1270_s19 = smov 0   ;;  %s1355_s0 = inlined_call_operand.vmem [shape: f32[2,4,256], index: 0, kind: input, shape index: {}]   ;;  %s1356_s1 = inlined_call_operand.vmem [shape: f32[2,4], index: 1, kind: input, shape index: {}]   ;;  %s1357_s2 = inlined_call_operand.vmem [shape: f32[2,1], index: 2, kind: input, shape index: {}]   ;;  %s1358_s3 = inlined_call_operand.hbm [shape: f32[256,1024], index: 3, kind: input, shape index: {}]   ;;  %s1359_s4 = inlined_call_operand.vmem [shape: f32[2,2,1024], index: 4, kind: input, shape index: {}]   ;;  %s1360_s5 = inlined_call_operand.vmem [shape: f32[2,4,1024], index: 5, kind: output, shape index: {}]  }
   0x1   :  { %s1272_s20 = smov 0  }
   0x2 LB: > { %s1115_s21 = sadd.s32 4294967295, %s1232_s20   ;;  %s28_s22 = sadd.s32 1, %s1228_s19  ;;  %s1232_s20 = sphi %s1272_s20, %s16_s20   ;;  %s1228_s19 = sphi %s1270_s19, %s1362_s19   ;;  %s1224_s18 = sphi %s1268_s18, %s1361_s18  }
   0x3   : > { %p30_p0 = scmp.ge.s32.totalorder %s28_s22, 2  ;;  %p1117_p1 = scmp.ge.s32.totalorder %s1232_s20, 1 }
   0x4   : > { %p180_p2 = scmp.lt.s32.totalorder %s1232_s20, 3  ;;  %p1145_p4 = scmp.eq.s32.totalorder %s1115_s21, 0 }
   0x5   : > { %s1364_s22 = smov (%p30_p0, %s28_s22), 0  ;;  %s197_s25 = sshll.u32 %s1358_s3, 4  ;;  %s198_s25 = int_to_ptr.hbm [resolvable:$true] %s197_s25 }
   0x6   : > { %p181_p3 = pnand %p1117_p1, %p180_p2  ;;  %s1234_s26 = smov [#allocation2]  }
   0x7   : > { %s199_s27 = sshll.u32 %s1234_s26, 4  ;;  %s1235_s28 = smov 1024   ;;  %s200_s27 = int_to_ptr.vmem [resolvable:$true] %s199_s27 }
   0x8   : > { %p1141_p5 = pneg %p181_p3  ;;  %s1236_s29 = smov 64  }
   0x9   : > { %241 = sbr.rel (%p181_p3) target bundleno = 364 (0x16c), region = 40 }
   0xa   : > { %p1142_p6 = pnand %p1145_p4, %p1141_p5 }
   0xc   : > { %1144 = dma.hbm_to_vmem [thread:$0]  (!%p1142_p6), %s198_s25, 32768, %s200_s27, [#allocation3], %s1235_s28, %s1235_s28, %s1236_s29  }
   0xe   : > { %1219 = dma.done.wait (%p1145_p4), [#allocation3], 32768  }
   0xf   : > { %1221 = vsyncadd (%p1145_p4), [#allocation3], 4294934528  ;;  %p288_p7 = scmp.lt.s32.totalorder %s1224_s18, 1  ;;  %v1237_v0 = vmov 0   ;;  %v319_v3 = vld [vmem:[%s1357_s2] sm:$0x3] }
  0x10   : > { %1175 = vset.pattern.permute.xlu0 %v1237_v0  ;;  %v498_v4 = vld [vmem:[#allocation2 + $0x3c0] sm:$0xff]  ;;  %vm333_vm0 = vcmask 1043456   ;;  %v317_v11 = vld [vmem:[%s1356_s1] sm:$0x3]  ;;  %vm329_vm1 = vcmask 31744   ;;  %v499_v12 = vld [vmem:[#allocation2 + $0x3c8] sm:$0xff] }
  0x11   : > { %s1366_s18 = smov (!%p288_p7, %s1224_s18), 1  ;;  %322 = vperm.xlu0 %1175, %v319_v3   ;;  %v626_v5 = vld [vmem:[#allocation2 + $0x7c0] sm:$0xff]  ;;  %634 = vmatpush.msra.mxu2 %v498_v4  ;;  %v627_v13 = vld [vmem:[#allocation2 + $0x7c8] sm:$0xff]  ;;  %v500_v4 = vld [vmem:[#allocation2 + $0x3d0] sm:$0xff] }
  0x12   : > { %s1134_s30 = sshll.u32 %s1366_s18, 3  ;;  %s1135_s6 = sshll.u32 %s1366_s18, 4  ;;  %654 = vmatpush.msra.mxu3 %v626_v5  ;;  %v490_v6 = vld [vmem:[#allocation2 + $0x380] sm:$0xff]  ;;  %v491_v18 = vld [vmem:[#allocation2 + $0x388] sm:$0xff]  ;;  %v628_v5 = vld [vmem:[#allocation2 + $0x7d0] sm:$0xff] }
  0x13   : > { %s295_s9 = scalar_lea.vmem %s1355_s0, %s1134_s30  ;;  %s305_s12 = scalar_lea.vmem %s1359_s4, %s1135_s6  ;;  %v618_v7 = vld [vmem:[#allocation2 + $0x780] sm:$0xff]  ;;  %635 = vmatpush.msra.mxu2 %v490_v6  ;;  %v619_v19 = vld [vmem:[#allocation2 + $0x788] sm:$0xff] }
  0x14   : > { %v318_v1 = vld [vmem:[%s295_s9] sm:$0xff]  ;;  %v979_v2 = vld [vmem:[%s305_s12 + $0x8] sm:$0xff]  ;;  %655 = vmatpush.msra.mxu3 %v618_v7  ;;  %v483_v22 = vld [vmem:[#allocation2 + $0x348] sm:$0xff]  ;;  %s1136_s17 = sshll.u32 %s1366_s18, 5 }
  0x15   : > { %326 = vst [vmem:[#allocation1] ss:$2 sm:$0xff] %v318_v1  ;;  %v482_v8 = vld [vmem:[#allocation2 + $0x340] sm:$0xff]  ;;  %v978_v10 = vld [vmem:[%s305_s12] sm:$0xff]  ;;  %v611_v23 = vld [vmem:[#allocation2 + $0x748] sm:$0xff]  ;;  %s1320_s24 = scalar_lea.vmem %s1360_s5, %s1136_s17 }
  0x16   : > { %985 = vst [vmem:[#allocation1 + $0x11] ss:$2 sm:$0xff] %v979_v2  ;;  %v610_v9 = vld [vmem:[#allocation2 + $0x740] sm:$0xff]  ;;  %636 = vmatpush.msra.mxu2 %v482_v8  ;;  %v475_v26 = vld [vmem:[#allocation2 + $0x308] sm:$0xff]  ;;  %v492_v8 = vld [vmem:[#allocation2 + $0x390] sm:$0xff] }
  0x17   : > { %656 = vmatpush.msra.mxu3 %v610_v9  ;;  %v474_v16 = vld [vmem:[#allocation2 + $0x300] sm:$0xff]  ;;  %v603_v27 = vld [vmem:[#allocation2 + $0x708] sm:$0xff]  ;;  %v620_v9 = vld [vmem:[#allocation2 + $0x790] sm:$0xff] }
  0x18   : > { %v602_v17 = vld [vmem:[#allocation2 + $0x700] sm:$0xff]  ;;  %637 = vmatpush.msra.mxu2 %v474_v16  ;;  %v467_v30 = vld [vmem:[#allocation2 + $0x2c8] sm:$0xff]  ;;  %v493_v16 = vld [vmem:[#allocation2 + $0x398] sm:$0xff] }
  0x19   : > { %v466_v20 = vld [vmem:[#allocation2 + $0x2c0] sm:$0xff]  ;;  %657 = vmatpush.msra.mxu3 %v602_v17  ;;  %v595_v31 = vld [vmem:[#allocation2 + $0x6c8] sm:$0xff]  ;;  %v621_v17 = vld [vmem:[#allocation2 + $0x798] sm:$0xff] }
  0x1a   : > { %v594_v21 = vld [vmem:[#allocation2 + $0x6c0] sm:$0xff]  ;;  %638 = vmatpush.msra.mxu2 %v466_v20  ;;  %v459_v34 = vld [vmem:[#allocation2 + $0x288] sm:$0xff]  ;;  %v485_v20 = vld [vmem:[#allocation2 + $0x358] sm:$0xff] }
  0x1b   : > { %v458_v24 = vld [vmem:[#allocation2 + $0x280] sm:$0xff]  ;;  %658 = vmatpush.msra.mxu3 %v594_v21  ;;  %v587_v35 = vld [vmem:[#allocation2 + $0x688] sm:$0xff]  ;;  %v613_v21 = vld [vmem:[#allocation2 + $0x758] sm:$0xff] }
  0x1c   : > { %v327_v14 = vld.sshfl [vmem:[#allocation1] sm:$0xff pattern:$0x75316420]  ;;  %v328_v15 = vld.sshfl [vmem:[#allocation1 + $0x8] sm:$0xff pattern:$0x75316420]  ;;  %639 = vmatpush.msra.mxu2 %v458_v24 }
  0x1d   : > { %1128 = vmatpush.msk.msra.mxu0 %vm333_vm0, %v327_v14  ;;  %1130 = vmatpush.msk.msra.mxu1 %vm333_vm0, %v328_v15  ;;  %983 = vst [vmem:[#allocation1 + $0x1] ss:$2 sm:$0xff] %v978_v10  ;;  %v586_v25 = vld [vmem:[#allocation2 + $0x680] sm:$0xff]  ;;  %v451_v38 = vld [vmem:[#allocation2 + $0x248] sm:$0xff]  ;;  %v484_v14 = vld [vmem:[#allocation2 + $0x350] sm:$0xff] }
  0x1e   : > { %1129 = vmatmul.msk.f32.vlgmr.msra.gmra.mxu0 %vm329_vm1, %v317_v11  ;;  %1131 = vmatmul.msk.f32.vlgmr.msra.gmra.mxu1 %vm329_vm1, %v317_v11  ;;  %v450_v28 = vld [vmem:[#allocation2 + $0x240] sm:$0xff]  ;;  %v579_v39 = vld [vmem:[#allocation2 + $0x648] sm:$0xff]  ;;  %v612_v15 = vld [vmem:[#allocation2 + $0x750] sm:$0xff] }
  0x1f   : > { %674 = vmatpush.msrb.mxu0 %v499_v12  ;;  %694 = vmatpush.msrb.mxu1 %v627_v13  ;;  %v578_v29 = vld [vmem:[#allocation2 + $0x640] sm:$0xff]  ;;  %v443_v42 = vld [vmem:[#allocation2 + $0x208] sm:$0xff]  ;;  %v501_v12 = vld [vmem:[#allocation2 + $0x3d8] sm:$0xff] }
  0x20   : > { %659 = vmatpush.msra.mxu3 %v586_v25  ;;  %v442_v32 = vld [vmem:[#allocation2 + $0x200] sm:$0xff]  ;;  %640 = vmatpush.msra.mxu2 %v450_v28  ;;  %v571_v43 = vld [vmem:[#allocation2 + $0x608] sm:$0xff]  ;;  %v629_v13 = vld [vmem:[#allocation2 + $0x7d8] sm:$0xff] }
  0x21   : > { %675 = vmatpush.msrb.mxu0 %v491_v18  ;;  %695 = vmatpush.msrb.mxu1 %v619_v19  ;;  %v570_v33 = vld [vmem:[#allocation2 + $0x600] sm:$0xff]  ;;  %v435_v46 = vld [vmem:[#allocation2 + $0x1c8] sm:$0xff]  ;;  %v476_v18 = vld [vmem:[#allocation2 + $0x310] sm:$0xff] }
  0x22   : > { %660 = vmatpush.msra.mxu3 %v578_v29  ;;  %v434_v36 = vld [vmem:[#allocation2 + $0x1c0] sm:$0xff]  ;;  %641 = vmatpush.msra.mxu2 %v442_v32  ;;  %v563_v47 = vld [vmem:[#allocation2 + $0x5c8] sm:$0xff]  ;;  %v604_v19 = vld [vmem:[#allocation2 + $0x710] sm:$0xff] }
  0x23   : > { %676 = vmatpush.msrb.mxu0 %v483_v22  ;;  %696 = vmatpush.msrb.mxu1 %v611_v23  ;;  %v562_v37 = vld [vmem:[#allocation2 + $0x5c0] sm:$0xff]  ;;  %v427_v50 = vld [vmem:[#allocation2 + $0x188] sm:$0xff]  ;;  %v468_v22 = vld [vmem:[#allocation2 + $0x2d0] sm:$0xff] }
  0x24   : > { %661 = vmatpush.msra.mxu3 %v570_v33  ;;  %v426_v40 = vld [vmem:[#allocation2 + $0x180] sm:$0xff]  ;;  %642 = vmatpush.msra.mxu2 %v434_v36  ;;  %v555_v51 = vld [vmem:[#allocation2 + $0x588] sm:$0xff]  ;;  %v596_v23 = vld [vmem:[#allocation2 + $0x6d0] sm:$0xff] }
  0x25   : > { %677 = vmatpush.msrb.mxu0 %v475_v26  ;;  %697 = vmatpush.msrb.mxu1 %v603_v27  ;;  %v554_v41 = vld [vmem:[#allocation2 + $0x580] sm:$0xff]  ;;  %v419_v54 = vld [vmem:[#allocation2 + $0x148] sm:$0xff]  ;;  %v477_v24 = vld [vmem:[#allocation2 + $0x318] sm:$0xff] }
  0x26   : > { %662 = vmatpush.msra.mxu3 %v562_v37  ;;  %v418_v44 = vld [vmem:[#allocation2 + $0x140] sm:$0xff]  ;;  %643 = vmatpush.msra.mxu2 %v426_v40  ;;  %v547_v55 = vld [vmem:[#allocation2 + $0x548] sm:$0xff]  ;;  %v605_v25 = vld [vmem:[#allocation2 + $0x718] sm:$0xff] }
  0x27   : > { %678 = vmatpush.msrb.mxu0 %v467_v30  ;;  %698 = vmatpush.msrb.mxu1 %v595_v31  ;;  %v546_v45 = vld [vmem:[#allocation2 + $0x540] sm:$0xff]  ;;  %v411_v58 = vld [vmem:[#allocation2 + $0x108] sm:$0xff]  ;;  %v460_v26 = vld [vmem:[#allocation2 + $0x290] sm:$0xff] }
  0x28   : > { %663 = vmatpush.msra.mxu3 %v554_v41  ;;  %v410_v48 = vld [vmem:[#allocation2 + $0x100] sm:$0xff]  ;;  %644 = vmatpush.msra.mxu2 %v418_v44  ;;  %v539_v59 = vld [vmem:[#allocation2 + $0x508] sm:$0xff]  ;;  %v588_v27 = vld [vmem:[#allocation2 + $0x690] sm:$0xff] }
  0x29   : > { %679 = vmatpush.msrb.mxu0 %v459_v34  ;;  %699 = vmatpush.msrb.mxu1 %v587_v35  ;;  %v538_v49 = vld [vmem:[#allocation2 + $0x500] sm:$0xff]  ;;  %v403_v62 = vld [vmem:[#allocation2 + $0xc8] sm:$0xff]  ;;  %v469_v28 = vld [vmem:[#allocation2 + $0x2d8] sm:$0xff] }
  0x2a   : > { %664 = vmatpush.msra.mxu3 %v546_v45  ;;  %v402_v52 = vld [vmem:[#allocation2 + $0xc0] sm:$0xff]  ;;  %645 = vmatpush.msra.mxu2 %v410_v48  ;;  %v531_v63 = vld [vmem:[#allocation2 + $0x4c8] sm:$0xff]  ;;  %v597_v29 = vld [vmem:[#allocation2 + $0x6d8] sm:$0xff] }
  0x2b   : > { %680 = vmatpush.msrb.mxu0 %v451_v38  ;;  %700 = vmatpush.msrb.mxu1 %v579_v39  ;;  %v530_v53 = vld [vmem:[#allocation2 + $0x4c0] sm:$0xff]  ;;  %v395_v2 = vld [vmem:[#allocation2 + $0x88] sm:$0xff]  ;;  %v452_v30 = vld [vmem:[#allocation2 + $0x250] sm:$0xff] }
  0x2c   : > { %665 = vmatpush.msra.mxu3 %v538_v49  ;;  %v394_v56 = vld [vmem:[#allocation2 + $0x80] sm:$0xff]  ;;  %646 = vmatpush.msra.mxu2 %v402_v52  ;;  %v523_v3 = vld [vmem:[#allocation2 + $0x488] sm:$0xff]  ;;  %v580_v31 = vld [vmem:[#allocation2 + $0x650] sm:$0xff] }
  0x2d   : > { %681 = vmatpush.msrb.mxu0 %v443_v42  ;;  %701 = vmatpush.msrb.mxu1 %v571_v43  ;;  %v522_v57 = vld [vmem:[#allocation2 + $0x480] sm:$0xff]  ;;  %v387_v6 = vld [vmem:[#allocation2 + $0x48] sm:$0xff]  ;;  %v461_v32 = vld [vmem:[#allocation2 + $0x298] sm:$0xff] }
  0x2e   : > { %666 = vmatpush.msra.mxu3 %v530_v53  ;;  %v386_v60 = vld [vmem:[#allocation2 + $0x40] sm:$0xff]  ;;  %647 = vmatpush.msra.mxu2 %v394_v56  ;;  %v515_v7 = vld [vmem:[#allocation2 + $0x448] sm:$0xff]  ;;  %v589_v33 = vld [vmem:[#allocation2 + $0x698] sm:$0xff] }
  0x2f   : > { %682 = vmatpush.msrb.mxu0 %v435_v46  ;;  %702 = vmatpush.msrb.mxu1 %v563_v47  ;;  %v514_v61 = vld [vmem:[#allocation2 + $0x440] sm:$0xff]  ;;  %v379_v10 = vld [vmem:[#allocation2 + $0x8] sm:$0xff]  ;;  %v444_v34 = vld [vmem:[#allocation2 + $0x210] sm:$0xff] }
  0x30   : > { %667 = vmatpush.msra.mxu3 %v522_v57  ;;  %v378_v0 = vld [vmem:[#allocation2] sm:$0xff]  ;;  %648 = vmatpush.msra.mxu2 %v386_v60  ;;  %v507_v11 = vld [vmem:[#allocation2 + $0x408] sm:$0xff]  ;;  %v572_v35 = vld [vmem:[#allocation2 + $0x610] sm:$0xff] }
  0x31   : > { %683 = vmatpush.msrb.mxu0 %v427_v50  ;;  %703 = vmatpush.msrb.mxu1 %v555_v51  ;;  %v506_v1 = vld [vmem:[#allocation2 + $0x400] sm:$0xff]  ;;  %v453_v36 = vld [vmem:[#allocation2 + $0x258] sm:$0xff]  ;;  %v436_v38 = vld [vmem:[#allocation2 + $0x1d0] sm:$0xff] }
  0x32   : > { %668 = vmatpush.msra.mxu3 %v514_v61  ;;  %649 = vmatpush.msra.mxu2 %v378_v0  ;;  %v581_v37 = vld [vmem:[#allocation2 + $0x658] sm:$0xff]  ;;  %v564_v39 = vld [vmem:[#allocation2 + $0x5d0] sm:$0xff] }
  0x33   : > { %684 = vmatpush.msrb.mxu0 %v419_v54  ;;  %704 = vmatpush.msrb.mxu1 %v547_v55  ;;  %v445_v40 = vld [vmem:[#allocation2 + $0x218] sm:$0xff]  ;;  %v428_v42 = vld [vmem:[#allocation2 + $0x190] sm:$0xff] }
  0x34   : > { %669 = vmatpush.msra.mxu3 %v506_v1  ;;  %714 = vmatpush.msrb.mxu2 %v500_v4  ;;  %v573_v41 = vld [vmem:[#allocation2 + $0x618] sm:$0xff]  ;;  %v556_v43 = vld [vmem:[#allocation2 + $0x590] sm:$0xff] }
  0x35   : > { %685 = vmatpush.msrb.mxu0 %v411_v58  ;;  %705 = vmatpush.msrb.mxu1 %v539_v59  ;;  %v437_v44 = vld [vmem:[#allocation2 + $0x1d8] sm:$0xff]  ;;  %v420_v46 = vld [vmem:[#allocation2 + $0x150] sm:$0xff] }
  0x36   : > { %734 = vmatpush.msrb.mxu3 %v628_v5  ;;  %715 = vmatpush.msrb.mxu2 %v492_v8  ;;  %v565_v45 = vld [vmem:[#allocation2 + $0x5d8] sm:$0xff]  ;;  %v548_v47 = vld [vmem:[#allocation2 + $0x550] sm:$0xff] }
  0x37   : > { %686 = vmatpush.msrb.mxu0 %v403_v62  ;;  %706 = vmatpush.msrb.mxu1 %v531_v63  ;;  %v429_v48 = vld [vmem:[#allocation2 + $0x198] sm:$0xff]  ;;  %v412_v50 = vld [vmem:[#allocation2 + $0x110] sm:$0xff] }
  0x38   : > { %735 = vmatpush.msrb.mxu3 %v620_v9  ;;  %716 = vmatpush.msrb.mxu2 %v484_v14  ;;  %v557_v49 = vld [vmem:[#allocation2 + $0x598] sm:$0xff]  ;;  %v540_v51 = vld [vmem:[#allocation2 + $0x510] sm:$0xff]  ;;  %v630_v14 = vld [vmem:[#allocation2 + $0x7e0] sm:$0xff] }
  0x39   : > { %687 = vmatpush.msrb.mxu0 %v395_v2  ;;  %707 = vmatpush.msrb.mxu1 %v523_v3  ;;  %v421_v52 = vld [vmem:[#allocation2 + $0x158] sm:$0xff]  ;;  %v404_v54 = vld [vmem:[#allocation2 + $0xd0] sm:$0xff] }
  0x3a   : > { %736 = vmatpush.msrb.mxu3 %v612_v15  ;;  %717 = vmatpush.msrb.mxu2 %v476_v18  ;;  %v549_v53 = vld [vmem:[#allocation2 + $0x558] sm:$0xff]  ;;  %v532_v55 = vld [vmem:[#allocation2 + $0x4d0] sm:$0xff]  ;;  %v503_v15 = vld [vmem:[#allocation2 + $0x3e8] sm:$0xff] }
  0x3b   : > { %688 = vmatpush.msrb.mxu0 %v387_v6  ;;  %708 = vmatpush.msrb.mxu1 %v515_v7  ;;  %v413_v56 = vld [vmem:[#allocation2 + $0x118] sm:$0xff]  ;;  %v396_v58 = vld [vmem:[#allocation2 + $0x90] sm:$0xff]  ;;  %v622_v18 = vld [vmem:[#allocation2 + $0x7a0] sm:$0xff] }
  0x3c   : > { %737 = vmatpush.msrb.mxu3 %v604_v19  ;;  %718 = vmatpush.msrb.mxu2 %v468_v22  ;;  %v541_v57 = vld [vmem:[#allocation2 + $0x518] sm:$0xff]  ;;  %v524_v59 = vld [vmem:[#allocation2 + $0x490] sm:$0xff]  ;;  %v987_v22 = vld.sshfl [vmem:[#allocation1 + $0x8] sm:$0xff pattern:$0x75643120] }
  0x3d   : > { %689 = vmatpush.msrb.mxu0 %v379_v10  ;;  %709 = vmatpush.msrb.mxu1 %v507_v11  ;;  %v405_v60 = vld [vmem:[#allocation2 + $0xd8] sm:$0xff]  ;;  %v388_v62 = vld [vmem:[#allocation2 + $0x50] sm:$0xff]  ;;  %995 = vst [vmem:[%s1320_s24 + $0x8] sm:$0xcc] %v987_v22 }
  0x3e   : > { %738 = vmatpush.msrb.mxu3 %v596_v23  ;;  %719 = vmatpush.msrb.mxu2 %v460_v26  ;;  %v533_v61 = vld [vmem:[#allocation2 + $0x4d8] sm:$0xff]  ;;  %v516_v63 = vld [vmem:[#allocation2 + $0x450] sm:$0xff]  ;;  %v486_v23 = vld [vmem:[#allocation2 + $0x360] sm:$0xff] }
  0x3f   : > { %754 = vmatpush.msra.mxu0 %v501_v12  ;;  %774 = vmatpush.msra.mxu1 %v629_v13  ;;  %v397_v0 = vld [vmem:[#allocation2 + $0x98] sm:$0xff]  ;;  %v380_v4 = vld [vmem:[#allocation2 + $0x10] sm:$0xff]  ;;  %v502_v13 = vld [vmem:[#allocation2 + $0x3e0] sm:$0xff] }
  0x40   : > { %739 = vmatpush.msrb.mxu3 %v588_v27  ;;  %720 = vmatpush.msrb.mxu2 %v452_v30  ;;  %v525_v1 = vld [vmem:[#allocation2 + $0x498] sm:$0xff]  ;;  %v508_v5 = vld [vmem:[#allocation2 + $0x410] sm:$0xff]  ;;  %v615_v26 = vld [vmem:[#allocation2 + $0x768] sm:$0xff] }
  0x41   : > { %755 = vmatpush.msra.mxu0 %v493_v16  ;;  %775 = vmatpush.msra.mxu1 %v621_v17  ;;  %v389_v2 = vld [vmem:[#allocation2 + $0x58] sm:$0xff]  ;;  %v631_v16 = vld [vmem:[#allocation2 + $0x7e8] sm:$0xff]  ;;  %v494_v17 = vld [vmem:[#allocation2 + $0x3a0] sm:$0xff] }
  0x42   : > { %740 = vmatpush.msrb.mxu3 %v580_v31  ;;  %721 = vmatpush.msrb.mxu2 %v444_v34  ;;  %v517_v3 = vld [vmem:[#allocation2 + $0x458] sm:$0xff]  ;;  %v478_v27 = vld [vmem:[#allocation2 + $0x320] sm:$0xff]  ;;  %v607_v30 = vld [vmem:[#allocation2 + $0x728] sm:$0xff] }
  0x43   : > { %756 = vmatpush.msra.mxu0 %v485_v20  ;;  %776 = vmatpush.msra.mxu1 %v613_v21  ;;  %v381_v6 = vld [vmem:[#allocation2 + $0x18] sm:$0xff]  ;;  %v495_v20 = vld [vmem:[#allocation2 + $0x3a8] sm:$0xff]  ;;  %v470_v31 = vld [vmem:[#allocation2 + $0x2e0] sm:$0xff] }
  0x44   : > { %741 = vmatpush.msrb.mxu3 %v572_v35  ;;  %722 = vmatpush.msrb.mxu2 %v436_v38  ;;  %v509_v7 = vld [vmem:[#allocation2 + $0x418] sm:$0xff]  ;;  %v623_v21 = vld [vmem:[#allocation2 + $0x7a8] sm:$0xff]  ;;  %v462_v35 = vld [vmem:[#allocation2 + $0x2a0] sm:$0xff] }
  0x45   : > { %757 = vmatpush.msra.mxu0 %v477_v24  ;;  %777 = vmatpush.msra.mxu1 %v605_v25  ;;  %v986_v19 = vld.sshfl [vmem:[#allocation1] sm:$0xff pattern:$0x75643120]  ;;  %v614_v24 = vld [vmem:[#allocation2 + $0x760] sm:$0xff]  ;;  %v487_v25 = vld [vmem:[#allocation2 + $0x368] sm:$0xff] }
  0x46   : > { %742 = vmatpush.msrb.mxu3 %v564_v39  ;;  %723 = vmatpush.msrb.mxu2 %v428_v42  ;;  %994 = vst [vmem:[%s1320_s24] sm:$0xcc] %v986_v19  ;;  %v599_v34 = vld [vmem:[#allocation2 + $0x6e8] sm:$0xff]  ;;  %v454_v39 = vld [vmem:[#allocation2 + $0x260] sm:$0xff]  ;;  %v505_v19 = vld [vmem:[#allocation2 + $0x3f8] sm:$0xff] }
  0x47   : > { %758 = vmatpush.msra.mxu0 %v469_v28  ;;  %778 = vmatpush.msra.mxu1 %v597_v29  ;;  %v606_v28 = vld [vmem:[#allocation2 + $0x720] sm:$0xff]  ;;  %v479_v29 = vld [vmem:[#allocation2 + $0x328] sm:$0xff]  ;;  %v624_v22 = vld [vmem:[#allocation2 + $0x7b0] sm:$0xff] }
  0x48   : > { %743 = vmatpush.msrb.mxu3 %v556_v43  ;;  %724 = vmatpush.msrb.mxu2 %v420_v46  ;;  %v591_v38 = vld [vmem:[#allocation2 + $0x6a8] sm:$0xff]  ;;  %v446_v43 = vld [vmem:[#allocation2 + $0x220] sm:$0xff] }
  0x49   : > { %759 = vmatpush.msra.mxu0 %v461_v32  ;;  %779 = vmatpush.msra.mxu1 %v589_v33  ;;  %v598_v32 = vld [vmem:[#allocation2 + $0x6e0] sm:$0xff]  ;;  %v471_v33 = vld [vmem:[#allocation2 + $0x2e8] sm:$0xff] }
  0x4a   : > { %744 = vmatpush.msrb.mxu3 %v548_v47  ;;  %725 = vmatpush.msrb.mxu2 %v412_v50  ;;  %v583_v42 = vld [vmem:[#allocation2 + $0x668] sm:$0xff]  ;;  %v438_v47 = vld [vmem:[#allocation2 + $0x1e0] sm:$0xff] }
  0x4b   : > { %760 = vmatpush.msra.mxu0 %v453_v36  ;;  %780 = vmatpush.msra.mxu1 %v581_v37  ;;  %v590_v36 = vld [vmem:[#allocation2 + $0x6a0] sm:$0xff]  ;;  %v463_v37 = vld [vmem:[#allocation2 + $0x2a8] sm:$0xff] }
  0x4c   : > { %745 = vmatpush.msrb.mxu3 %v540_v51  ;;  %726 = vmatpush.msrb.mxu2 %v404_v54  ;;  %v575_v46 = vld [vmem:[#allocation2 + $0x628] sm:$0xff]  ;;  %v430_v51 = vld [vmem:[#allocation2 + $0x1a0] sm:$0xff] }
  0x4d   : > { %761 = vmatpush.msra.mxu0 %v445_v40  ;;  %781 = vmatpush.msra.mxu1 %v573_v41  ;;  %v582_v40 = vld [vmem:[#allocation2 + $0x660] sm:$0xff]  ;;  %v455_v41 = vld [vmem:[#allocation2 + $0x268] sm:$0xff] }
  0x4e   : > { %746 = vmatpush.msrb.mxu3 %v532_v55  ;;  %727 = vmatpush.msrb.mxu2 %v396_v58  ;;  %v567_v50 = vld [vmem:[#allocation2 + $0x5e8] sm:$0xff]  ;;  %v422_v55 = vld [vmem:[#allocation2 + $0x160] sm:$0xff] }
  0x4f   : > { %762 = vmatpush.msra.mxu0 %v437_v44  ;;  %782 = vmatpush.msra.mxu1 %v565_v45  ;;  %v574_v44 = vld [vmem:[#allocation2 + $0x620] sm:$0xff]  ;;  %v447_v45 = vld [vmem:[#allocation2 + $0x228] sm:$0xff] }
  0x50   : > { %747 = vmatpush.msrb.mxu3 %v524_v59  ;;  %728 = vmatpush.msrb.mxu2 %v388_v62  ;;  %v559_v54 = vld [vmem:[#allocation2 + $0x5a8] sm:$0xff]  ;;  %v414_v59 = vld [vmem:[#allocation2 + $0x120] sm:$0xff] }
  0x51   : > { %763 = vmatpush.msra.mxu0 %v429_v48  ;;  %783 = vmatpush.msra.mxu1 %v557_v49  ;;  %v566_v48 = vld [vmem:[#allocation2 + $0x5e0] sm:$0xff]  ;;  %v439_v49 = vld [vmem:[#allocation2 + $0x1e8] sm:$0xff] }
  0x52   : > { %748 = vmatpush.msrb.mxu3 %v516_v63  ;;  %729 = vmatpush.msrb.mxu2 %v380_v4  ;;  %v551_v58 = vld [vmem:[#allocation2 + $0x568] sm:$0xff]  ;;  %v406_v63 = vld [vmem:[#allocation2 + $0xe0] sm:$0xff] }
  0x53   : > { %764 = vmatpush.msra.mxu0 %v421_v52  ;;  %784 = vmatpush.msra.mxu1 %v549_v53  ;;  %v558_v52 = vld [vmem:[#allocation2 + $0x5a0] sm:$0xff]  ;;  %v431_v53 = vld [vmem:[#allocation2 + $0x1a8] sm:$0xff] }
  0x54   : > { %749 = vmatpush.msrb.mxu3 %v508_v5  ;;  %v543_v62 = vld [vmem:[#allocation2 + $0x528] sm:$0xff]  ;;  %v526_v4 = vld [vmem:[#allocation2 + $0x4a0] sm:$0xff] }
  0x55   : > { %765 = vmatpush.msra.mxu0 %v413_v56  ;;  %785 = vmatpush.msra.mxu1 %v541_v57  ;;  %v550_v56 = vld [vmem:[#allocation2 + $0x560] sm:$0xff]  ;;  %v423_v57 = vld [vmem:[#allocation2 + $0x168] sm:$0xff] }
  0x56   : > { %v399_v5 = vld [vmem:[#allocation2 + $0xa8] sm:$0xff] }
  0x57   : > { %766 = vmatpush.msra.mxu0 %v405_v60  ;;  %786 = vmatpush.msra.mxu1 %v533_v61  ;;  %v542_v60 = vld [vmem:[#allocation2 + $0x520] sm:$0xff]  ;;  %v415_v61 = vld [vmem:[#allocation2 + $0x128] sm:$0xff] }
  0x59   : > { %767 = vmatpush.msra.mxu0 %v397_v0  ;;  %787 = vmatpush.msra.mxu1 %v525_v1  ;;  %v534_v0 = vld [vmem:[#allocation2 + $0x4e0] sm:$0xff]  ;;  %v407_v1 = vld [vmem:[#allocation2 + $0xe8] sm:$0xff] }
  0x5b   : > { %768 = vmatpush.msra.mxu0 %v389_v2  ;;  %788 = vmatpush.msra.mxu1 %v517_v3  ;;  %v535_v2 = vld [vmem:[#allocation2 + $0x4e8] sm:$0xff]  ;;  %v398_v3 = vld [vmem:[#allocation2 + $0xa0] sm:$0xff] }
  0x5d   : > { %769 = vmatpush.msra.mxu0 %v381_v6  ;;  %789 = vmatpush.msra.mxu1 %v509_v7  ;;  %v527_v6 = vld [vmem:[#allocation2 + $0x4a8] sm:$0xff]  ;;  %v390_v7 = vld [vmem:[#allocation2 + $0x60] sm:$0xff] }
  0x83   : > { %v323_v8 = vpop.permute.xlu0 %322 }
  0x9b   : > { %v355_v9 = vpop.f32.mrf.mxu0  ;;  %v375_v10 = vpop.f32.mrf.mxu1 }
  0x9c   : > { %v1308_v11 = vadd.f32 %v355_v9, %v323_v8  ;;  %v1310_v12 = vadd.f32 %v375_v10, %v323_v8  ;;  %v518_v8 = vld [vmem:[#allocation2 + $0x460] sm:$0xff]  ;;  %v391_v9 = vld [vmem:[#allocation2 + $0x68] sm:$0xff] }
  0x9d   : > { %v519_v10 = vld [vmem:[#allocation2 + $0x468] sm:$0xff] }
  0x9e   : > { %650 = vmatmul.f32.vlgmr.msra.gmra.mxu2 %v1308_v11  ;;  %670 = vmatmul.f32.vlgmr.msra.gmra.mxu3 %v1310_v12 }
  0x9f   : > { %690 = vmatmul.f32.vlgmr.msrb.gmra.mxu0 %v1308_v11  ;;  %710 = vmatmul.f32.vlgmr.msrb.gmra.mxu1 %v1310_v12 }
  0xa0   : > { %794 = vmatpush.msra.mxu2 %v502_v13  ;;  %814 = vmatpush.msra.mxu3 %v630_v14  ;;  %v382_v13 = vld [vmem:[#allocation2 + $0x20] sm:$0xff] }
  0xa1   : > { %834 = vmatpush.msrb.mxu0 %v503_v15  ;;  %854 = vmatpush.msrb.mxu1 %v631_v16  ;;  %v510_v14 = vld [vmem:[#allocation2 + $0x420] sm:$0xff]  ;;  %v383_v15 = vld [vmem:[#allocation2 + $0x28] sm:$0xff] }
  0xa2   : > { %795 = vmatpush.msra.mxu2 %v494_v17  ;;  %815 = vmatpush.msra.mxu3 %v622_v18  ;;  %v511_v16 = vld [vmem:[#allocation2 + $0x428] sm:$0xff]  ;;  %v504_v17 = vld [vmem:[#allocation2 + $0x3f0] sm:$0xff] }
  0xa3   : > { %835 = vmatpush.msrb.mxu0 %v495_v20  ;;  %855 = vmatpush.msrb.mxu1 %v623_v21  ;;  %v632_v18 = vld [vmem:[#allocation2 + $0x7f0] sm:$0xff]  ;;  %v633_v20 = vld [vmem:[#allocation2 + $0x7f8] sm:$0xff] }
  0xa4   : > { %796 = vmatpush.msra.mxu2 %v486_v23  ;;  %816 = vmatpush.msra.mxu3 %v614_v24  ;;  %v496_v21 = vld [vmem:[#allocation2 + $0x3b0] sm:$0xff]  ;;  %v497_v23 = vld [vmem:[#allocation2 + $0x3b8] sm:$0xff] }
  0xa5   : > { %836 = vmatpush.msrb.mxu0 %v487_v25  ;;  %856 = vmatpush.msrb.mxu1 %v615_v26  ;;  %v625_v24 = vld [vmem:[#allocation2 + $0x7b8] sm:$0xff]  ;;  %v488_v25 = vld [vmem:[#allocation2 + $0x370] sm:$0xff] }
  0xa6   : > { %797 = vmatpush.msra.mxu2 %v478_v27  ;;  %817 = vmatpush.msra.mxu3 %v606_v28  ;;  %v616_v26 = vld [vmem:[#allocation2 + $0x770] sm:$0xff]  ;;  %v489_v27 = vld [vmem:[#allocation2 + $0x378] sm:$0xff] }
  0xa7   : > { %837 = vmatpush.msrb.mxu0 %v479_v29  ;;  %857 = vmatpush.msrb.mxu1 %v607_v30  ;;  %v617_v28 = vld [vmem:[#allocation2 + $0x778] sm:$0xff]  ;;  %v480_v29 = vld [vmem:[#allocation2 + $0x330] sm:$0xff] }
  0xa8   : > { %730 = vmatmul.f32.vlgmr.msrb.gmra.mxu2 %v1308_v11  ;;  %750 = vmatmul.f32.vlgmr.msrb.gmra.mxu3 %v1310_v12  ;;  %v608_v30 = vld [vmem:[#allocation2 + $0x730] sm:$0xff] }
  0xa9   : > { %770 = vmatmul.f32.vlgmr.msra.gmra.mxu0 %v1308_v11  ;;  %790 = vmatmul.f32.vlgmr.msra.gmra.mxu1 %v1310_v12 }
  0xaa   : > { %798 = vmatpush.msra.mxu2 %v470_v31  ;;  %818 = vmatpush.msra.mxu3 %v598_v32  ;;  %v481_v31 = vld [vmem:[#allocation2 + $0x338] sm:$0xff] }
  0xab   : > { %838 = vmatpush.msrb.mxu0 %v471_v33  ;;  %858 = vmatpush.msrb.mxu1 %v599_v34  ;;  %v609_v32 = vld [vmem:[#allocation2 + $0x738] sm:$0xff]  ;;  %v472_v33 = vld [vmem:[#allocation2 + $0x2f0] sm:$0xff] }
  0xac   : > { %799 = vmatpush.msra.mxu2 %v462_v35  ;;  %819 = vmatpush.msra.mxu3 %v590_v36  ;;  %v600_v34 = vld [vmem:[#allocation2 + $0x6f0] sm:$0xff]  ;;  %v473_v35 = vld [vmem:[#allocation2 + $0x2f8] sm:$0xff] }
  0xad   : > { %839 = vmatpush.msrb.mxu0 %v463_v37  ;;  %859 = vmatpush.msrb.mxu1 %v591_v38  ;;  %v601_v36 = vld [vmem:[#allocation2 + $0x6f8] sm:$0xff]  ;;  %v464_v37 = vld [vmem:[#allocation2 + $0x2b0] sm:$0xff] }
  0xae   : > { %800 = vmatpush.msra.mxu2 %v454_v39  ;;  %820 = vmatpush.msra.mxu3 %v582_v40  ;;  %v592_v38 = vld [vmem:[#allocation2 + $0x6b0] sm:$0xff]  ;;  %v465_v39 = vld [vmem:[#allocation2 + $0x2b8] sm:$0xff] }
  0xaf   : > { %840 = vmatpush.msrb.mxu0 %v455_v41  ;;  %860 = vmatpush.msrb.mxu1 %v583_v42  ;;  %v593_v40 = vld [vmem:[#allocation2 + $0x6b8] sm:$0xff]  ;;  %v456_v41 = vld [vmem:[#allocation2 + $0x270] sm:$0xff] }
  0xb0   : > { %801 = vmatpush.msra.mxu2 %v446_v43  ;;  %821 = vmatpush.msra.mxu3 %v574_v44  ;;  %v584_v42 = vld [vmem:[#allocation2 + $0x670] sm:$0xff]  ;;  %v457_v43 = vld [vmem:[#allocation2 + $0x278] sm:$0xff] }
  0xb1   : > { %841 = vmatpush.msrb.mxu0 %v447_v45  ;;  %861 = vmatpush.msrb.mxu1 %v575_v46  ;;  %v585_v44 = vld [vmem:[#allocation2 + $0x678] sm:$0xff]  ;;  %v448_v45 = vld [vmem:[#allocation2 + $0x230] sm:$0xff] }
  0xb2   : > { %802 = vmatpush.msra.mxu2 %v438_v47  ;;  %822 = vmatpush.msra.mxu3 %v566_v48  ;;  %v576_v46 = vld [vmem:[#allocation2 + $0x630] sm:$0xff]  ;;  %v449_v47 = vld [vmem:[#allocation2 + $0x238] sm:$0xff] }
  0xb3   : > { %842 = vmatpush.msrb.mxu0 %v439_v49  ;;  %862 = vmatpush.msrb.mxu1 %v567_v50  ;;  %v577_v48 = vld [vmem:[#allocation2 + $0x638] sm:$0xff]  ;;  %v440_v49 = vld [vmem:[#allocation2 + $0x1f0] sm:$0xff] }
  0xb4   : > { %803 = vmatpush.msra.mxu2 %v430_v51  ;;  %823 = vmatpush.msra.mxu3 %v558_v52  ;;  %v568_v50 = vld [vmem:[#allocation2 + $0x5f0] sm:$0xff]  ;;  %v441_v51 = vld [vmem:[#allocation2 + $0x1f8] sm:$0xff] }
  0xb5   : > { %843 = vmatpush.msrb.mxu0 %v431_v53  ;;  %863 = vmatpush.msrb.mxu1 %v559_v54  ;;  %v569_v52 = vld [vmem:[#allocation2 + $0x5f8] sm:$0xff]  ;;  %v432_v53 = vld [vmem:[#allocation2 + $0x1b0] sm:$0xff] }
  0xb6   : > { %804 = vmatpush.msra.mxu2 %v422_v55  ;;  %824 = vmatpush.msra.mxu3 %v550_v56  ;;  %v560_v54 = vld [vmem:[#allocation2 + $0x5b0] sm:$0xff]  ;;  %v433_v55 = vld [vmem:[#allocation2 + $0x1b8] sm:$0xff] }
  0xb7   : > { %844 = vmatpush.msrb.mxu0 %v423_v57  ;;  %864 = vmatpush.msrb.mxu1 %v551_v58  ;;  %v561_v56 = vld [vmem:[#allocation2 + $0x5b8] sm:$0xff]  ;;  %v424_v57 = vld [vmem:[#allocation2 + $0x170] sm:$0xff] }
  0xb8   : > { %805 = vmatpush.msra.mxu2 %v414_v59  ;;  %825 = vmatpush.msra.mxu3 %v542_v60  ;;  %v552_v58 = vld [vmem:[#allocation2 + $0x570] sm:$0xff]  ;;  %v425_v59 = vld [vmem:[#allocation2 + $0x178] sm:$0xff] }
  0xb9   : > { %845 = vmatpush.msrb.mxu0 %v415_v61  ;;  %865 = vmatpush.msrb.mxu1 %v543_v62  ;;  %v553_v60 = vld [vmem:[#allocation2 + $0x578] sm:$0xff]  ;;  %v416_v61 = vld [vmem:[#allocation2 + $0x130] sm:$0xff] }
  0xba   : > { %806 = vmatpush.msra.mxu2 %v406_v63  ;;  %826 = vmatpush.msra.mxu3 %v534_v0  ;;  %v544_v62 = vld [vmem:[#allocation2 + $0x530] sm:$0xff]  ;;  %v417_v63 = vld [vmem:[#allocation2 + $0x138] sm:$0xff] }
  0xbb   : > { %846 = vmatpush.msrb.mxu0 %v407_v1  ;;  %866 = vmatpush.msrb.mxu1 %v535_v2  ;;  %v545_v0 = vld [vmem:[#allocation2 + $0x538] sm:$0xff]  ;;  %v408_v1 = vld [vmem:[#allocation2 + $0xf0] sm:$0xff] }
  0xbc   : > { %807 = vmatpush.msra.mxu2 %v398_v3  ;;  %827 = vmatpush.msra.mxu3 %v526_v4  ;;  %v536_v2 = vld [vmem:[#allocation2 + $0x4f0] sm:$0xff]  ;;  %v409_v3 = vld [vmem:[#allocation2 + $0xf8] sm:$0xff] }
  0xbd   : > { %847 = vmatpush.msrb.mxu0 %v399_v5  ;;  %867 = vmatpush.msrb.mxu1 %v527_v6  ;;  %v537_v4 = vld [vmem:[#allocation2 + $0x4f8] sm:$0xff]  ;;  %v400_v5 = vld [vmem:[#allocation2 + $0xb0] sm:$0xff] }
  0xbe   : > { %808 = vmatpush.msra.mxu2 %v390_v7  ;;  %828 = vmatpush.msra.mxu3 %v518_v8  ;;  %v528_v6 = vld [vmem:[#allocation2 + $0x4b0] sm:$0xff]  ;;  %v401_v7 = vld [vmem:[#allocation2 + $0xb8] sm:$0xff] }
  0xbf   : > { %848 = vmatpush.msrb.mxu0 %v391_v9  ;;  %868 = vmatpush.msrb.mxu1 %v519_v10  ;;  %v529_v8 = vld [vmem:[#allocation2 + $0x4b8] sm:$0xff]  ;;  %v392_v9 = vld [vmem:[#allocation2 + $0x70] sm:$0xff] }
  0xc0   : > { %809 = vmatpush.msra.mxu2 %v382_v13  ;;  %829 = vmatpush.msra.mxu3 %v510_v14  ;;  %v520_v10 = vld [vmem:[#allocation2 + $0x470] sm:$0xff]  ;;  %v393_v13 = vld [vmem:[#allocation2 + $0x78] sm:$0xff] }
  0xc1   : > { %849 = vmatpush.msrb.mxu0 %v383_v15  ;;  %869 = vmatpush.msrb.mxu1 %v511_v16  ;;  %v521_v14 = vld [vmem:[#allocation2 + $0x478] sm:$0xff]  ;;  %v384_v15 = vld [vmem:[#allocation2 + $0x30] sm:$0xff] }
  0xc2   : > { %810 = vmatmul.f32.vlgmr.msra.gmra.mxu2 %v1308_v11  ;;  %830 = vmatmul.f32.vlgmr.msra.gmra.mxu3 %v1310_v12  ;;  %v512_v16 = vld [vmem:[#allocation2 + $0x430] sm:$0xff] }
  0xc3   : > { %850 = vmatmul.f32.vlgmr.msrb.gmra.mxu0 %v1308_v11  ;;  %870 = vmatmul.f32.vlgmr.msrb.gmra.mxu1 %v1310_v12 }
  0xc4   : > { %874 = vmatpush.msrb.mxu2 %v504_v17  ;;  %894 = vmatpush.msrb.mxu3 %v632_v18  ;;  %v385_v17 = vld [vmem:[#allocation2 + $0x38] sm:$0xff] }
  0xc5   : > { %914 = vmatpush.msra.mxu0 %v505_v19  ;;  %934 = vmatpush.msra.mxu1 %v633_v20  ;;  %v513_v18 = vld [vmem:[#allocation2 + $0x438] sm:$0xff]  ;;  %v988_v19 = vld.sshfl [vmem:[#allocation1 + $0x10] sm:$0xff pattern:$0x75643120] }
  0xc6   : > { %875 = vmatpush.msrb.mxu2 %v496_v21  ;;  %895 = vmatpush.msrb.mxu3 %v624_v22  ;;  %v989_v20 = vld.sshfl [vmem:[#allocation1 + $0x18] sm:$0xff pattern:$0x75643120]  ;;  %996 = vst [vmem:[%s1320_s24 + $0x10] sm:$0xcc] %v988_v19 }
  0xc7   : > { %915 = vmatpush.msra.mxu0 %v497_v23  ;;  %935 = vmatpush.msra.mxu1 %v625_v24  ;;  %997 = vst [vmem:[%s1320_s24 + $0x18] sm:$0xcc] %v989_v20 }
  0xc8   : > { %876 = vmatpush.msrb.mxu2 %v488_v25  ;;  %896 = vmatpush.msrb.mxu3 %v616_v26 }
  0xc9   : > { %916 = vmatpush.msra.mxu0 %v489_v27  ;;  %936 = vmatpush.msra.mxu1 %v617_v28 }
  0xca   : > { %877 = vmatpush.msrb.mxu2 %v480_v29  ;;  %897 = vmatpush.msrb.mxu3 %v608_v30 }
  0xcb   : > { %917 = vmatpush.msra.mxu0 %v481_v31  ;;  %937 = vmatpush.msra.mxu1 %v609_v32 }
  0xcc   : > { %878 = vmatpush.msrb.mxu2 %v472_v33  ;;  %898 = vmatpush.msrb.mxu3 %v600_v34 }
  0xcd   : > { %918 = vmatpush.msra.mxu0 %v473_v35  ;;  %938 = vmatpush.msra.mxu1 %v601_v36 }
  0xce   : > { %879 = vmatpush.msrb.mxu2 %v464_v37  ;;  %899 = vmatpush.msrb.mxu3 %v592_v38 }
  0xcf   : > { %919 = vmatpush.msra.mxu0 %v465_v39  ;;  %939 = vmatpush.msra.mxu1 %v593_v40 }
  0xd0   : > { %880 = vmatpush.msrb.mxu2 %v456_v41  ;;  %900 = vmatpush.msrb.mxu3 %v584_v42 }
  0xd1   : > { %920 = vmatpush.msra.mxu0 %v457_v43  ;;  %940 = vmatpush.msra.mxu1 %v585_v44 }
  0xd2   : > { %881 = vmatpush.msrb.mxu2 %v448_v45  ;;  %901 = vmatpush.msrb.mxu3 %v576_v46 }
  0xd3   : > { %921 = vmatpush.msra.mxu0 %v449_v47  ;;  %941 = vmatpush.msra.mxu1 %v577_v48 }
  0xd4   : > { %882 = vmatpush.msrb.mxu2 %v440_v49  ;;  %902 = vmatpush.msrb.mxu3 %v568_v50 }
  0xd5   : > { %922 = vmatpush.msra.mxu0 %v441_v51  ;;  %942 = vmatpush.msra.mxu1 %v569_v52 }
  0xd6   : > { %883 = vmatpush.msrb.mxu2 %v432_v53  ;;  %903 = vmatpush.msrb.mxu3 %v560_v54 }
  0xd7   : > { %923 = vmatpush.msra.mxu0 %v433_v55  ;;  %943 = vmatpush.msra.mxu1 %v561_v56 }
  0xd8   : > { %884 = vmatpush.msrb.mxu2 %v424_v57  ;;  %904 = vmatpush.msrb.mxu3 %v552_v58 }
  0xd9   : > { %924 = vmatpush.msra.mxu0 %v425_v59  ;;  %944 = vmatpush.msra.mxu1 %v553_v60 }
  0xda   : > { %885 = vmatpush.msrb.mxu2 %v416_v61  ;;  %905 = vmatpush.msrb.mxu3 %v544_v62 }
  0xdb   : > { %925 = vmatpush.msra.mxu0 %v417_v63  ;;  %945 = vmatpush.msra.mxu1 %v545_v0 }
  0xdc   : > { %886 = vmatpush.msrb.mxu2 %v408_v1  ;;  %906 = vmatpush.msrb.mxu3 %v536_v2 }
  0xdd   : > { %926 = vmatpush.msra.mxu0 %v409_v3  ;;  %946 = vmatpush.msra.mxu1 %v537_v4 }
  0xde   : > { %887 = vmatpush.msrb.mxu2 %v400_v5  ;;  %907 = vmatpush.msrb.mxu3 %v528_v6 }
  0xdf   : > { %927 = vmatpush.msra.mxu0 %v401_v7  ;;  %947 = vmatpush.msra.mxu1 %v529_v8 }
  0xe0   : > { %888 = vmatpush.msrb.mxu2 %v392_v9  ;;  %908 = vmatpush.msrb.mxu3 %v520_v10 }
  0xe1   : > { %928 = vmatpush.msra.mxu0 %v393_v13  ;;  %948 = vmatpush.msra.mxu1 %v521_v14 }
  0xe2   : > { %889 = vmatpush.msrb.mxu2 %v384_v15  ;;  %909 = vmatpush.msrb.mxu3 %v512_v16 }
  0xe3   : > { %929 = vmatpush.msra.mxu0 %v385_v17  ;;  %949 = vmatpush.msra.mxu1 %v513_v18 }
  0xe4   : > { %890 = vmatmul.f32.vlgmr.msrb.gmra.mxu2 %v1308_v11  ;;  %910 = vmatmul.f32.vlgmr.msrb.gmra.mxu3 %v1310_v12 }
  0xe5   : > { %930 = vmatmul.f32.vlgmr.msra.gmra.mxu0 %v1308_v11  ;;  %950 = vmatmul.f32.vlgmr.msra.gmra.mxu1 %v1310_v12 }
 0x11c   : > { %v691_v21 = vpop.f32.mrf.mxu0  ;;  %v711_v22 = vpop.f32.mrf.mxu1 }
 0x11d   : > { %v712_v23 = vadd.f32 %v711_v22, %v691_v21 }
 0x11f   : > { %v962_v26 = vrot.slane %v712_v23, 4 }
 0x121   : > { %v651_v24 = vpop.f32.mrf.mxu2  ;;  %v671_v25 = vpop.f32.mrf.mxu3 }
 0x122   : > { %v672_v27 = vadd.f32 %v671_v25, %v651_v24 }
 0x124   : > { %v966_v28 = vsel %vm333_vm0, %v672_v27, %v962_v26 }
 0x125   : > { %974 = vst [vmem:[%s1320_s24] sm:$0x33] %v966_v28 }
 0x126   : > { %v771_v29 = vpop.f32.mrf.mxu0  ;;  %v791_v30 = vpop.f32.mrf.mxu1 }
 0x127   : > { %v792_v11 = vadd.f32 %v791_v30, %v771_v29 }
 0x129   : > { %v963_v32 = vrot.slane %v792_v11, 4 }
 0x12b   : > { %v731_v12 = vpop.f32.mrf.mxu2  ;;  %v751_v31 = vpop.f32.mrf.mxu3 }
 0x12c   : > { %v752_v33 = vadd.f32 %v751_v31, %v731_v12 }
 0x12e   : > { %v967_v34 = vsel %vm333_vm0, %v752_v33, %v963_v32 }
 0x12f   : > { %975 = vst [vmem:[%s1320_s24 + $0x8] sm:$0x33] %v967_v34 }
 0x140   : > { %v851_v35 = vpop.f32.mrf.mxu0  ;;  %v871_v36 = vpop.f32.mrf.mxu1 }
 0x141   : > { %v872_v37 = vadd.f32 %v871_v36, %v851_v35 }
 0x143   : > { %v964_v40 = vrot.slane %v872_v37, 4 }
 0x145   : > { %v811_v38 = vpop.f32.mrf.mxu2  ;;  %v831_v39 = vpop.f32.mrf.mxu3 }
 0x146   : > { %v832_v41 = vadd.f32 %v831_v39, %v811_v38 }
 0x148   : > { %v968_v42 = vsel %vm333_vm0, %v832_v41, %v964_v40 }
 0x149   : > { %976 = vst [vmem:[%s1320_s24 + $0x10] sm:$0x33] %v968_v42 }
 0x162   : > { %v931_v43 = vpop.f32.mrf.mxu0  ;;  %v951_v44 = vpop.f32.mrf.mxu1 }
 0x163   : > { %v952_v45 = vadd.f32 %v951_v44, %v931_v43 }
 0x165   : > { %v965_v48 = vrot.slane %v952_v45, 4 }
 0x167   : > { %v891_v46 = vpop.f32.mrf.mxu2  ;;  %v911_v47 = vpop.f32.mrf.mxu3 }
 0x168   : > { %v912_v49 = vadd.f32 %v911_v47, %v891_v46 }
 0x16a   : > { %v969_v50 = vsel %vm333_vm0, %v912_v49, %v965_v48 }
 0x16b   : > { %977 = vst [vmem:[%s1320_s24 + $0x18] sm:$0x33] %v969_v50 }
 0x16c PF: > { %s16_s20 = sadd.s32 1, %s1232_s20   ;;  %s1361_s18 = smov %s1228_s19 }
 0x16d   : > { %p13_p8 = scmp.ge.s32.totalorder %s16_s20, 4   ;;  %s1362_s19 = smov %s1364_s22 }
 0x16f   :  { %15 = sbr.rel (!%p13_p8) target bundleno = 2 (0x2), region = 80 }
 0x174   :  { %1028 = vsyncpa [#allocation3], 1 }
 0x175   :  { %1030 = vsyncpa [#allocation3 + $0x1], 1 }

</bundles_post_ra>
